<compile_context>
chip_gen: v5e
topology: v5e:2x2
jax: 0.10.0
libtpu: 0.0.40
codegen_flags: <defaults>
</compile_context>

<pallas_src>
import jax
import jax.numpy as jnp
from jax.experimental import pallas as pl
from jax.experimental.pallas import tpu as pltpu

SUBLANE = 8


def _round_up(n, m):
    return ((n + m - 1) // m) * m


def reinforce_fwd_kernel(x_ref, w1_ref, b1_ref, w2_ref, b2_ref, out_ref):
    """One batch tile: probs = softmax(relu(x @ W1 + b1) @ W2 + b2, axis=-1).

    x_ref  : (TB, S)   state rows (f32)
    w1_ref : (S, H)    fc1 weight (f32 or bf16, stored transposed vs torch)
    b1_ref : (1, H)    fc1 bias (f32)
    w2_ref : (H, A)    fc2 weight (f32 or bf16)
    b2_ref : (1, A)    fc2 bias (f32)
    out_ref: (TB, A)   per-state action probabilities (f32)
    """
    mxu_dtype = w1_ref.dtype
    x = x_ref[...].astype(mxu_dtype)
    h = jnp.maximum(
        jnp.dot(x, w1_ref[...], preferred_element_type=jnp.float32)
        + b1_ref[...],
        0.0)
    logits = (jnp.dot(h.astype(w2_ref.dtype), w2_ref[...],
                      preferred_element_type=jnp.float32)
              + b2_ref[...])
    m = jnp.max(logits, axis=-1, keepdims=True)
    e = jnp.exp(logits - m)
    s = jnp.sum(e, axis=-1, keepdims=True)
    out_ref[...] = e / s  # exact division: rows sum to 1 to f32 precision


def reinforce_forward_batch(x, w1, b1, w2, b2, *, block_rows=512,
                            mxu_dtype=jnp.float32):
    """x: (B, numStates) -> (B, numActions) per-state action probabilities."""
    b, num_states = x.shape
    hidden = w1.shape[1]
    num_actions = w2.shape[1]

    b8 = _round_up(b, SUBLANE)
    tb = min(block_rows, b8)                      # batch tile, multiple of 8
    if b8 >= 2 * SUBLANE:
        # Guarantee >=2 grid steps so ("parallel",) can use both TCs on v7x.
        tb = min(tb, _round_up(-(-b8 // 2), SUBLANE))
    b_pad = _round_up(b, tb)

    x_pad = x.astype(jnp.float32)
    if b_pad != b:
        x_pad = jnp.pad(x_pad, ((0, b_pad - b), (0, 0)))  # small batch pad only

    w1c = w1.astype(mxu_dtype)
    w2c = w2.astype(mxu_dtype)
    b1r = b1.astype(jnp.float32).reshape(1, hidden)
    b2r = b2.astype(jnp.float32).reshape(1, num_actions)

    grid = (b_pad // tb,)
    out = pl.pallas_call(
        reinforce_fwd_kernel,
        out_shape=jax.ShapeDtypeStruct((b_pad, num_actions), jnp.float32),
        grid_spec=pltpu.PrefetchScalarGridSpec(
            num_scalar_prefetch=0,
            grid=grid,
            in_specs=[
                # x: tiled over the batch axis only; last dim = full array dim
                pl.BlockSpec((tb, num_states), lambda i: (i, 0)),
                # weights/biases: one full-array block, same block every grid
                # step -> resident in VMEM, DMA'd once
                pl.BlockSpec((num_states, hidden), lambda i: (0, 0)),
                pl.BlockSpec((1, hidden), lambda i: (0, 0)),
                pl.BlockSpec((hidden, num_actions), lambda i: (0, 0)),
                pl.BlockSpec((1, num_actions), lambda i: (0, 0)),
            ],
            out_specs=pl.BlockSpec((tb, num_actions), lambda i: (i, 0)),
        ),
        compiler_params=pltpu.CompilerParams(
            dimension_semantics=("parallel",)),   # batch tiles across TCs
    )(x_pad, w1c, b1r, w2c, b2r)
    return out[:b]


def reinforce_forward_single(state_1d, w1, b1, w2, b2):
    """act()-style path: one 1-D state -> (numActions,) probabilities."""
    # TODO(synk): at B=1 the call is launch-overhead dominated on every TPU
    # generation; batch env steps / fuse sampling into the same call (or just
    # use plain XLA) for the act() hot path.
    return reinforce_forward_batch(state_1d.reshape(1, -1), w1, b1, w2, b2)[0]


def init_params(key, num_states, hidden_units, num_actions):
    """Deterministic PyTorch-style (uniform +-1/sqrt(fan_in)) init."""
    k1, k2, k3, k4 = jax.random.split(key, 4)
    bound1 = 1.0 / jnp.sqrt(num_states)
    bound2 = 1.0 / jnp.sqrt(hidden_units)
    # stored transposed relative to torch's nn.Linear weight
    w1 = jax.random.uniform(k1, (num_states, hidden_units), jnp.float32,
                            -bound1, bound1)
    b1 = jax.random.uniform(k2, (hidden_units,), jnp.float32, -bound1, bound1)
    w2 = jax.random.uniform(k3, (hidden_units, num_actions), jnp.float32,
                            -bound2, bound2)
    b2 = jax.random.uniform(k4, (num_actions,), jnp.float32, -bound2, bound2)
    return w1, b1, w2, b2


if __name__ == "__main__":
    num_states = 16      # numStates
    hidden_units = 32    # hiddenUnits (module default)
    num_actions = 10     # numActions (module default)
    batch = 20           # small trajectory of states (learn() path)

    key = jax.random.PRNGKey(0)
    k_params, k_x = jax.random.split(key)
    w1, b1, w2, b2 = init_params(k_params, num_states, hidden_units, num_actions)
    states = jax.random.normal(k_x, (batch, num_states), jnp.float32)

    # pure-JAX reference of the forward semantics (per-state softmax)
    h_ref = jnp.maximum(states @ w1 + b1, 0.0)
    logits_ref = h_ref @ w2 + b2
    probs_ref = jax.nn.softmax(logits_ref, axis=-1)

    # --- batched forward (grid has 2 steps: batch split across TCs on v7x) --
    probs = reinforce_forward_batch(states, w1, b1, w2, b2)
    probs = jax.block_until_ready(probs)
    assert probs.shape == (batch, num_actions)
    assert jnp.allclose(probs, probs_ref, atol=2e-3, rtol=2e-3)
    assert jnp.allclose(jnp.sum(probs, axis=-1), 1.0, atol=1e-3)

    # --- smaller batch tile: multi-step grid with VMEM-resident weights -----
    probs_tiled = reinforce_forward_batch(states, w1, b1, w2, b2, block_rows=8)
    probs_tiled = jax.block_until_ready(probs_tiled)
    assert jnp.allclose(probs_tiled, probs_ref, atol=2e-3, rtol=2e-3)
    assert jnp.allclose(jnp.sum(probs_tiled, axis=-1), 1.0, atol=1e-3)

    # --- bf16 MXU-operand variant (v6e/v7x win; safe on v5e too) ------------
    probs_bf16 = reinforce_forward_batch(states, w1, b1, w2, b2,
                                         mxu_dtype=jnp.bfloat16)
    probs_bf16 = jax.block_until_ready(probs_bf16)
    assert jnp.allclose(probs_bf16, probs_ref, atol=5e-2, rtol=5e-2)
    assert jnp.allclose(jnp.sum(probs_bf16, axis=-1), 1.0, atol=1e-3)

    # --- single-state act() path (matches softmax(dim=0) on a 1-D input) ----
    p1 = reinforce_forward_single(states[0], w1, b1, w2, b2)
    p1 = jax.block_until_ready(p1)
    p1_ref = jax.nn.softmax(jnp.maximum(states[0] @ w1 + b1, 0.0) @ w2 + b2,
                            axis=0)
    assert p1.shape == (num_actions,)
    assert jnp.allclose(p1, p1_ref, atol=2e-3, rtol=2e-3)

    # TODO(synk): Categorical sampling (act) and the REINFORCE/Adam update
    # (train) are host-side control flow + autograd, not part of forward().

    print("KERNEL_OK")
</pallas_src>

<mosaic_0001>
module attributes {stable_mosaic.version = 11 : i64} {
  func.func @reinforce_fwd_kernel(%arg0: i32, %arg1: memref<16x16xf32, #tpu.memory_space<vmem>>, %arg2: memref<16x32xf32, #tpu.memory_space<vmem>>, %arg3: memref<1x32xf32, #tpu.memory_space<vmem>>, %arg4: memref<32x10xf32, #tpu.memory_space<vmem>>, %arg5: memref<1x10xf32, #tpu.memory_space<vmem>>, %arg6: memref<16x10xf32, #tpu.memory_space<vmem>>) attributes {dimension_semantics = [#tpu.dimension_semantics<parallel>], iteration_bounds = array<i64: 2>, scalar_prefetch = 0 : i64, scratch_operands = 0 : i64, tpu.core_type = #tpu.core_type<tc>, window_params = [{transform_indices = @transform_0, window_bounds = array<i64: 16, 16>}, {pipeline_mode = #tpu.pipeline_mode<synchronous>, transform_indices = @transform_1, window_bounds = array<i64: 16, 32>}, {pipeline_mode = #tpu.pipeline_mode<synchronous>, transform_indices = @transform_2, window_bounds = array<i64: 1, 32>}, {pipeline_mode = #tpu.pipeline_mode<synchronous>, transform_indices = @transform_3, window_bounds = array<i64: 32, 10>}, {pipeline_mode = #tpu.pipeline_mode<synchronous>, transform_indices = @transform_4, window_bounds = array<i64: 1, 10>}, {transform_indices = @transform_5, window_bounds = array<i64: 16, 10>}]} {
    %c0 = arith.constant 0 : index
    %c0_0 = arith.constant 0 : index
    %0 = vector.load %arg1[%c0, %c0_0] : memref<16x16xf32, #tpu.memory_space<vmem>>, vector<16x16xf32>
    %c0_1 = arith.constant 0 : index
    %c0_2 = arith.constant 0 : index
    %1 = vector.load %arg2[%c0_1, %c0_2] : memref<16x32xf32, #tpu.memory_space<vmem>>, vector<16x32xf32>
    %cst = arith.constant dense<0.000000e+00> : vector<16x32xf32>
    %2 = tpu.matmul %0, %1, %cst {dimension_numbers = #tpu.dot_dimension_numbers<[1], [0], [0], [1], [0, 0, 1, 1], [], []>} : vector<16x16xf32>, vector<16x32xf32>, vector<16x32xf32> -> vector<16x32xf32>
    %c0_3 = arith.constant 0 : index
    %c0_4 = arith.constant 0 : index
    %3 = vector.load %arg3[%c0_3, %c0_4] : memref<1x32xf32, #tpu.memory_space<vmem>>, vector<1x32xf32>
    %4 = vector.broadcast %3 : vector<1x32xf32> to vector<16x32xf32>
    %5 = arith.addf %2, %4 : vector<16x32xf32>
    %cst_5 = arith.constant 0.000000e+00 : f32
    %6 = vector.broadcast %cst_5 : f32 to vector<16x32xf32>
    %7 = arith.maximumf %5, %6 : vector<16x32xf32>
    %c0_6 = arith.constant 0 : index
    %c0_7 = arith.constant 0 : index
    %8 = vector.load %arg4[%c0_6, %c0_7] : memref<32x10xf32, #tpu.memory_space<vmem>>, vector<32x10xf32>
    %cst_8 = arith.constant dense<0.000000e+00> : vector<16x10xf32>
    %9 = tpu.matmul %7, %8, %cst_8 {dimension_numbers = #tpu.dot_dimension_numbers<[1], [0], [0], [1], [0, 0, 1, 1], [], []>} : vector<16x32xf32>, vector<32x10xf32>, vector<16x10xf32> -> vector<16x10xf32>
    %c0_9 = arith.constant 0 : index
    %c0_10 = arith.constant 0 : index
    %10 = vector.load %arg5[%c0_9, %c0_10] : memref<1x10xf32, #tpu.memory_space<vmem>>, vector<1x10xf32>
    %11 = vector.broadcast %10 : vector<1x10xf32> to vector<16x10xf32>
    %12 = arith.addf %9, %11 : vector<16x10xf32>
    %cst_11 = arith.constant dense<0xFF800000> : vector<16xf32>
    %13 = vector.multi_reduction <maximumf>, %12, %cst_11 [1] : vector<16x10xf32> to vector<16xf32>
    %14 = vector.shape_cast %13 : vector<16xf32> to vector<16x1xf32>
    %15 = vector.broadcast %14 : vector<16x1xf32> to vector<16x10xf32>
    %16 = arith.subf %12, %15 : vector<16x10xf32>
    %17 = math.exp %16 : vector<16x10xf32>
    %cst_12 = arith.constant dense<0.000000e+00> : vector<16xf32>
    %18 = vector.multi_reduction <add>, %17, %cst_12 [1] : vector<16x10xf32> to vector<16xf32>
    %19 = vector.shape_cast %18 : vector<16xf32> to vector<16x1xf32>
    %20 = vector.broadcast %19 : vector<16x1xf32> to vector<16x10xf32>
    %21 = arith.divf %17, %20 : vector<16x10xf32>
    %c0_13 = arith.constant 0 : index
    %c0_14 = arith.constant 0 : index
    %22 = vector.load %arg6[%c0_13, %c0_14] : memref<16x10xf32, #tpu.memory_space<vmem>>, vector<16x10xf32>
    tpu.vector_store %arg6[%c0_13, %c0_14], %21 {strides = array<i32>} : memref<16x10xf32, #tpu.memory_space<vmem>>, vector<16x10xf32>,
    return
  }
  func.func @transform_0(%arg0: i32) -> (i32, i32) {
    %c0_i32 = arith.constant 0 : i32
    %c0_i32_0 = arith.constant 0 : i32
    return %arg0, %c0_i32 : i32, i32
  }
  func.func @transform_1(%arg0: i32) -> (i32, i32) {
    %c0_i32 = arith.constant 0 : i32
    %c0_i32_0 = arith.constant 0 : i32
    %c0_i32_1 = arith.constant 0 : i32
    return %c0_i32, %c0_i32_0 : i32, i32
  }
  func.func @transform_2(%arg0: i32) -> (i32, i32) {
    %c0_i32 = arith.constant 0 : i32
    %c0_i32_0 = arith.constant 0 : i32
    %c0_i32_1 = arith.constant 0 : i32
    return %c0_i32, %c0_i32_0 : i32, i32
  }
  func.func @transform_3(%arg0: i32) -> (i32, i32) {
    %c0_i32 = arith.constant 0 : i32
    %c0_i32_0 = arith.constant 0 : i32
    %c0_i32_1 = arith.constant 0 : i32
    return %c0_i32, %c0_i32_0 : i32, i32
  }
  func.func @transform_4(%arg0: i32) -> (i32, i32) {
    %c0_i32 = arith.constant 0 : i32
    %c0_i32_0 = arith.constant 0 : i32
    %c0_i32_1 = arith.constant 0 : i32
    return %c0_i32, %c0_i32_0 : i32, i32
  }
  func.func @transform_5(%arg0: i32) -> (i32, i32) {
    %c0_i32 = arith.constant 0 : i32
    %c0_i32_0 = arith.constant 0 : i32
    return %arg0, %c0_i32 : i32, i32
  }
}

</mosaic_0001>

<bundles_post_ra>
// kernel: tpu_custom_call.1
= control target key start
LH: loop header
LB: loop body
LE: loop exit
PB: predicated region body
PF: predicated region fallthrough
CT: control target
= control target key end

     0   :  { %s490_s18 = smov 0   ;;  %s544_s0 = inlined_call_operand.vmem [shape: f32[32,16], index: 0, kind: input, shape index: {}]   ;;  %s545_s1 = inlined_call_operand.vmem [shape: f32[16,32], index: 1, kind: input, shape index: {}]   ;;  %s546_s2 = inlined_call_operand.vmem [shape: f32[1,32], index: 2, kind: input, shape index: {}]   ;;  %s547_s3 = inlined_call_operand.vmem [shape: f32[32,10], index: 3, kind: input, shape index: {}]   ;;  %s548_s4 = inlined_call_operand.vmem [shape: f32[1,10], index: 4, kind: input, shape index: {}]   ;;  %s549_s5 = inlined_call_operand.vmem [shape: f32[32,10], index: 5, kind: output, shape index: {}]  }
   0x1 LB: > { %s413_s19 = sadd.s32 4294967295, %s458_s18   ;;  %p417_p0 = scmp.ge.s32.totalorder %s458_s18, 1  ;;  %s458_s18 = sphi %s490_s18, %s15_s18  }
   0x2   : > { %p188_p1 = scmp.lt.s32.totalorder %s458_s18, 3 }
   0x4   : > { %p189_p2 = pnand %p417_p0, %p188_p1 }
   0x5   : > { %s418_s24 = sshll.u32 (!%p189_p2), %s413_s19, 1 }
   0x6   : > { %192 = sbr.rel (%p189_p2) target bundleno = 550 (0x226), region = 40  ;;  %p217_p3 = scmp.lt.s32.totalorder (!%p189_p2), %s418_s24, 3 }
   0xb   : > { %v231_v0 = vld [vmem:[%s545_s1 + $0x8] sm:$0xff]  ;;  %v230_v1 = vld [vmem:[%s545_s1] sm:$0xff]  ;;  %v271_v2 = vld [vmem:[%s547_s3 + $0x18] sm:$0xff]  ;;  %s551_s24 = smov (!%p217_p3, %s418_s24), 3  ;;  %vm236_vm0 = vcmask 130048   ;;  %vm276_vm1 = vcmask 261120  }
   0xc   : > { %257 = vmatpush.msra.mxu0 %v231_v0  ;;  %428 = vmatpush.msra.mxu3 %v231_v0  ;;  %s419_s27 = sshll.u32 %s551_s24, 3  ;;  %v270_v5 = vld [vmem:[%s547_s3 + $0x10] sm:$0xff]  ;;  %v269_v6 = vld [vmem:[%s547_s3 + $0x8] sm:$0xff]  ;;  %v268_v7 = vld [vmem:[%s547_s3] sm:$0xff]  ;;  %vm306_vm2 = vcmask 80896  }
   0xd   : > { %295 = vmatpush.msra.mxu1 %v271_v2  ;;  %430 = vmatpush.msra.mxu2 %v271_v2  ;;  %s220_s30 = scalar_lea.vmem %s544_s0, %s419_s27  ;;  %v442_v8 = vld [vmem:[%s546_s2] ss:$0 sm:$0xff]  ;;  %s226_s19 = scalar_lea.vmem %s549_s5, %s419_s27 }
   0xe   : > { %258 = vmatpush.msra.mxu0 %v230_v1  ;;  %429 = vmatpush.msra.mxu3 %v230_v1  ;;  %v228_v3 = vld [vmem:[%s220_s30] sm:$0xff]  ;;  %v229_v4 = vld [vmem:[%s220_s30 + $0x8] sm:$0xff] }
   0xf   : > { %422 = vmatmul.msk.f32.vlgmr.msra.gmra.mxu0 %vm236_vm0, %v228_v3  ;;  %423 = vmatmul.msk.f32.vlgmr.msra.gmra.mxu3 %vm236_vm0, %v229_v4  ;;  %v443_v15 = vld [vmem:[%s548_s4] ss:$0 sm:$0xff] }
  0x10   : > { %296 = vmatpush.msra.mxu1 %v270_v5  ;;  %431 = vmatpush.msra.mxu2 %v270_v5 }
  0x12   : > { %297 = vmatpush.msra.mxu1 %v269_v6  ;;  %432 = vmatpush.msra.mxu2 %v269_v6 }
  0x14   : > { %298 = vmatpush.msra.mxu1 %v268_v7  ;;  %433 = vmatpush.msra.mxu2 %v268_v7 }
  0x8c   : > { %v260_v9 = vpop.f32.mrf.mxu0 }
  0x8d   : > { %v261_v10 = vadd.f32 %v442_v8, %v260_v9 }
  0x8f   : > { %v266_v11 = vmax.f32 %v261_v10, 0.0 }
  0x91   : > { %424 = vmatmul.msk.f32.vlgmr.msra.gmra.mxu1 %vm276_vm1, %v266_v11 }
  0x92   : > { %v263_v12 = vpop.f32.mrf.mxu3 }
  0x93   : > { %v264_v13 = vadd.f32 %v442_v8, %v263_v12 }
  0x95   : > { %v267_v14 = vmax.f32 %v264_v13, 0.0 }
  0x97   : > { %425 = vmatmul.msk.f32.vlgmr.msra.gmra.mxu2 %vm276_vm1, %v267_v14 }
 0x10e   : > { %v300_v16 = vpop.f32.mrf.mxu1 }
 0x10f   : > { %v301_v17 = vadd.f32 %v443_v15, %v300_v16 }
 0x111   : > { %v307_v18 = vsel %vm306_vm2, %v301_v17, -inf }
 0x112   : > { %308 = vmax.xlane.f32.xlu0 %v307_v18 }
 0x11a   : > { %v303_v19 = vpop.f32.mrf.mxu2 }
 0x11b   : > { %v304_v20 = vadd.f32 %v443_v15, %v303_v19 }
 0x11d   : > { %v310_v21 = vsel %vm306_vm2, %v304_v20, -inf }
 0x11e   : > { %311 = vmax.xlane.f32.xlu0 %v310_v21 }
 0x185   : > { %v309_v22 = vpop.xlane.xlu0 %308 }
 0x186   : > { %v313_v23 = vsub.f32 %v301_v17, %v309_v22 }
 0x188   : > { %v315_v24 = vmul.f32 1.442695, %v313_v23 }
 0x18a   : > { %444 = vpow2.f32 %v315_v24 }
 0x190   : > { %v445_v25 = vpop.eup %444 }
 0x191   : > { %v312_v26 = vpop.xlane.xlu0 %311  ;;  %v319_v27 = vsel %vm306_vm2, %v445_v25, 0.0 }
 0x192   : > { %v314_v28 = vsub.f32 %v304_v20, %v312_v26  ;;  %320 = vadd.xlane.f32.xlu1 %v319_v27 }
 0x194   : > { %v317_v29 = vmul.f32 1.442695, %v314_v28 }
 0x196   : > { %446 = vpow2.f32 %v317_v29 }
 0x19c   : > { %v447_v30 = vpop.eup %446 }
 0x19d   : > { %v322_v31 = vsel %vm306_vm2, %v447_v30, 0.0 }
 0x19e   : > { %323 = vadd.xlane.f32.xlu1 %v322_v31 }
 0x205   : > { %v321_v32 = vpop.xlane.xlu1 %320 }
 0x206   : > { %448 = vrcp.f32 %v321_v32  ;;  %v336_v36 = vand.u32 2147483648, %v321_v32  ;;  %v334_v38 = vand.u32 2147483647, %v321_v32  ;;  %vm330_vm4 = vweird.f32 %v321_v32 }
 0x208   : > { %v337_v41 = vor.u32 1.1754944e-38, %v336_v36  ;;  %vm335_vm6 = vcmp.eq.f32.partialorder %v334_v38, 8.507059e+37 }
 0x20c   : > { %v449_v33 = vpop.eup %448 }
 0x20d   : > { %v326_v34 = vmul.f32 %v449_v33, %v321_v32  ;;  %vm331_vm3 = vweird.f32 %v449_v33 }
 0x20e   : > { %vm332_vm5 = vmor %vm330_vm4, %vm331_vm3 }
 0x20f   : > { %v327_v35 = vsub.f32 1.0, %v326_v34 }
 0x211   : > { %v328_v37 = vmul.f32 %v449_v33, %v327_v35  ;;  %v324_v39 = vpop.xlane.xlu1 %323 }
 0x212   : > { %450 = vrcp.f32 %v324_v39  ;;  %v351_v48 = vand.u32 2147483648, %v324_v39  ;;  %v349_v50 = vand.u32 2147483647, %v324_v39  ;;  %vm345_vm8 = vweird.f32 %v324_v39 }
 0x213   : > { %v329_v40 = vadd.f32 %v449_v33, %v328_v37 }
 0x214   : > { %v352_v52 = vor.u32 1.1754944e-38, %v351_v48  ;;  %vm350_vm10 = vcmp.eq.f32.partialorder %v349_v50, 8.507059e+37 }
 0x215   : > { %v333_v42 = vsel %vm332_vm5, %v449_v33, %v329_v40 }
 0x216   : > { %v338_v43 = vsel %vm335_vm6, %v337_v41, %v333_v42 }
 0x217   : > { %v339_v44 = vmul.f32 %v445_v25, %v338_v43 }
 0x218   : > { %v451_v45 = vpop.eup %450 }
 0x219   : > { %355 = vst.msk [vmem:[%s226_s19] sm:$0xff] %vm306_vm2, %v339_v44  ;;  %v341_v46 = vmul.f32 %v451_v45, %v324_v39  ;;  %vm346_vm7 = vweird.f32 %v451_v45 }
 0x21a   : > { %vm347_vm9 = vmor %vm345_vm8, %vm346_vm7 }
 0x21b   : > { %v342_v47 = vsub.f32 1.0, %v341_v46 }
 0x21d   : > { %v343_v49 = vmul.f32 %v451_v45, %v342_v47 }
 0x21f   : > { %v344_v51 = vadd.f32 %v451_v45, %v343_v49 }
 0x221   : > { %v348_v53 = vsel %vm347_vm9, %v451_v45, %v344_v51 }
 0x222   : > { %v353_v54 = vsel %vm350_vm10, %v352_v52, %v348_v53 }
 0x223   : > { %v354_v55 = vmul.f32 %v447_v30, %v353_v54 }
 0x225   : > { %356 = vst.msk [vmem:[%s226_s19 + $0x8] sm:$0xff] %vm306_vm2, %v354_v55 }
 0x226 PF: > { %s15_s18 = sadd.s32 1, %s458_s18  }
 0x227   : > { %p12_p4 = scmp.ge.s32.totalorder %s15_s18, 4  }
 0x229   :  { %14 = sbr.rel (!%p12_p4) target bundleno = 1 (0x1), region = 70 }

</bundles_post_ra>
